<compile_context>
chip_gen: v5e
topology: v5e:2x2
jax: 0.10.0
libtpu: 0.0.40
codegen_flags: <defaults>
</compile_context>

<pallas_src>
import functools
import math

import jax
import jax.numpy as jnp
from jax.experimental import pallas as pl
from jax.experimental.pallas import tpu as pltpu

_LANE = 128
_SUBLANE = 8
_LANE_WIDTH = 512                       # lane-dense 2D width (multiple of 128)
_VMEM_BUDGET_BYTES = 32 * 1024 * 1024   # buffer budget: safe on v7x (64 MiB VMEM)
_VMEM_LIMIT_BYTES = 48 * 1024 * 1024    # above 16/32 MiB scoped defaults


def _round_up(x, m):
    return (x + m - 1) // m * m


# ---------------------------------------------------------------------------
# 'add' policy: out = sum(x_i)
# ---------------------------------------------------------------------------
def _add_kernel(*refs):
    # refs = (x0_ref, ..., x_{n-1}_ref, out_ref); accumulate in f32.
    in_refs, out_ref = refs[:-1], refs[-1]
    acc = in_refs[0][...].astype(jnp.float32)
    for r in in_refs[1:]:
        acc = acc + r[...].astype(jnp.float32)
    out_ref[...] = acc.astype(out_ref.dtype)


def merge_add(xs):
    xs = list(xs)
    orig_shape = xs[0].shape
    dtype = xs[0].dtype
    n_in = len(xs)
    if n_in == 1:
        return xs[0]

    # Lane-dense 2D view: flatten and pad so the array is (rows, 512) with
    # rows a multiple of the sublane tile (8).
    total = math.prod(orig_shape)
    total_p = _round_up(total, _LANE_WIDTH * _SUBLANE)
    rows = total_p // _LANE_WIDTH

    def to2d(x):
        flat = x.reshape(-1)
        if total_p != total:
            flat = jnp.pad(flat, (0, total_p - total))
        return flat.reshape(rows, _LANE_WIDTH)

    xs2d = [to2d(x) for x in xs]

    # Tile rows so ~2*(n_in + 1) double-buffered blocks fit the VMEM budget
    # (re-derived per input count; safe on v5e/v6e/v7x).
    itemsize = jnp.dtype(dtype).itemsize
    row_bytes = _LANE_WIDTH * itemsize
    max_tr = _VMEM_BUDGET_BYTES // (2 * (n_in + 1) * row_bytes)
    tr = max(_SUBLANE, (min(max_tr, rows) // _SUBLANE) * _SUBLANE)
    grid = (pl.cdiv(rows, tr),)

    out2d = pl.pallas_call(
        _add_kernel,
        out_shape=jax.ShapeDtypeStruct((rows, _LANE_WIDTH), dtype),
        grid=grid,
        in_specs=[pl.BlockSpec((tr, _LANE_WIDTH), lambda i: (i, 0))
                  for _ in xs2d],
        out_specs=pl.BlockSpec((tr, _LANE_WIDTH), lambda i: (i, 0)),
        compiler_params=pltpu.CompilerParams(
            dimension_semantics=("parallel",),   # split rows across v7x's 2 TCs
            vmem_limit_bytes=_VMEM_LIMIT_BYTES,
        ),
    )(*xs2d)

    return out2d.reshape(-1)[:total].reshape(orig_shape)


# ---------------------------------------------------------------------------
# 'cat' policy: out = concat(x_i, axis=1)   (channel axis, NCHW)
# ---------------------------------------------------------------------------
def _cat_kernel(channel_offsets, channel_sizes, *refs):
    in_refs, out_ref = refs[:-1], refs[-1]
    for r, off, c in zip(in_refs, channel_offsets, channel_sizes):
        out_ref[:, off:off + c, :] = r[...]


def merge_cat(xs):
    xs = list(xs)
    if len(xs) == 1:
        return xs[0]
    n, _, h, w = xs[0].shape
    dtype = xs[0].dtype
    hw = h * w

    channel_sizes = tuple(int(x.shape[1]) for x in xs)
    channel_offsets = []
    off = 0
    for c in channel_sizes:
        channel_offsets.append(off)
        off += c
    c_total = off

    # Lane-dense 3D view: (N, C_i, H*W) puts the full spatial extent on the
    # 128-lane axis instead of W alone.
    xs3d = [x.reshape(n, c, hw) for x, c in zip(xs, channel_sizes)]

    # Spatial tile: multiple of 128 sized from the VMEM budget; if H*W is not
    # a multiple of 128 take it whole (block dim == full extent is legal).
    itemsize = jnp.dtype(dtype).itemsize
    if hw % _LANE == 0:
        per_lane_bytes = 2 * 2 * c_total * itemsize  # in+out, double-buffered
        ts = (_VMEM_BUDGET_BYTES // per_lane_bytes) // _LANE * _LANE
        ts = min(hw, max(_LANE, ts))
    else:
        ts = hw
    grid = (n, pl.cdiv(hw, ts))

    in_specs = [pl.BlockSpec((1, c, ts), lambda b, s: (b, 0, s))
                for c in channel_sizes]
    out_spec = pl.BlockSpec((1, c_total, ts), lambda b, s: (b, 0, s))

    kernel = functools.partial(_cat_kernel, tuple(channel_offsets),
                               channel_sizes)
    out3d = pl.pallas_call(
        kernel,
        out_shape=jax.ShapeDtypeStruct((n, c_total, hw), dtype),
        grid=grid,
        in_specs=in_specs,
        out_specs=out_spec,
        compiler_params=pltpu.CompilerParams(
            dimension_semantics=("parallel", "parallel"),
            vmem_limit_bytes=_VMEM_LIMIT_BYTES,
        ),
    )(*xs3d)

    return out3d.reshape(n, c_total, h, w)


# ---------------------------------------------------------------------------
# MergeBlock wrapper mirroring the PyTorch module
# ---------------------------------------------------------------------------
class MergeBlock:
    def __init__(self, policy):
        if policy not in ["add", "cat"]:
            raise ValueError(
                "`merge_policy` must be one of: ['add', 'cat'], got {}".format(policy)
            )
        self.policy = policy

    def __call__(self, x):
        if self.policy == "add":
            return merge_add(list(x))
        else:  # 'cat'
            return merge_cat(list(x))


if __name__ == "__main__":
    key = jax.random.PRNGKey(0)
    k0, k1, k2 = jax.random.split(key, 3)
    # Three NCHW feature maps: batch=2, channels=4, spatial=16x16
    x0 = jax.random.normal(k0, (2, 4, 16, 16), dtype=jnp.float32)
    x1 = jax.random.normal(k1, (2, 4, 16, 16), dtype=jnp.float32)
    x2 = jax.random.normal(k2, (2, 4, 16, 16), dtype=jnp.float32)
    xs = [x0, x1, x2]

    # --- 'add' policy ---
    add_block = MergeBlock("add")
    out_add = jax.block_until_ready(add_block(xs))
    ref_add = x0 + x1 + x2
    assert out_add.shape == (2, 4, 16, 16)
    assert jnp.allclose(out_add, ref_add, atol=1e-5), "add policy mismatch"

    # --- 'cat' policy ---
    cat_block = MergeBlock("cat")
    out_cat = jax.block_until_ready(cat_block(xs))
    ref_cat = jnp.concatenate(xs, axis=1)
    assert out_cat.shape == (2, 12, 16, 16)
    assert jnp.allclose(out_cat, ref_cat, atol=1e-6), "cat policy mismatch"

    print("KERNEL_OK")
</pallas_src>

<mosaic_0001>
module attributes {stable_mosaic.version = 11 : i64} {
  func.func @_add_kernel(%arg0: i32, %arg1: memref<8x512xf32, #tpu.memory_space<vmem>>, %arg2: memref<8x512xf32, #tpu.memory_space<vmem>>, %arg3: memref<8x512xf32, #tpu.memory_space<vmem>>, %arg4: memref<8x512xf32, #tpu.memory_space<vmem>>) attributes {dimension_semantics = [#tpu.dimension_semantics<parallel>], iteration_bounds = array<i64: 1>, scalar_prefetch = 0 : i64, scratch_operands = 0 : i64, tpu.core_type = #tpu.core_type<tc>, window_params = [{transform_indices = @transform_0, window_bounds = array<i64: 8, 512>}, {transform_indices = @transform_1, window_bounds = array<i64: 8, 512>}, {transform_indices = @transform_2, window_bounds = array<i64: 8, 512>}, {transform_indices = @transform_3, window_bounds = array<i64: 8, 512>}]} {
    %c0 = arith.constant 0 : index
    %c0_0 = arith.constant 0 : index
    %0 = vector.load %arg1[%c0, %c0_0] : memref<8x512xf32, #tpu.memory_space<vmem>>, vector<8x512xf32>
    %c0_1 = arith.constant 0 : index
    %c0_2 = arith.constant 0 : index
    %1 = vector.load %arg2[%c0_1, %c0_2] : memref<8x512xf32, #tpu.memory_space<vmem>>, vector<8x512xf32>
    %2 = arith.addf %0, %1 : vector<8x512xf32>
    %c0_3 = arith.constant 0 : index
    %c0_4 = arith.constant 0 : index
    %3 = vector.load %arg3[%c0_3, %c0_4] : memref<8x512xf32, #tpu.memory_space<vmem>>, vector<8x512xf32>
    %4 = arith.addf %2, %3 : vector<8x512xf32>
    %c0_5 = arith.constant 0 : index
    %c0_6 = arith.constant 0 : index
    %5 = vector.load %arg4[%c0_5, %c0_6] : memref<8x512xf32, #tpu.memory_space<vmem>>, vector<8x512xf32>
    tpu.vector_store %arg4[%c0_5, %c0_6], %4 {strides = array<i32>} : memref<8x512xf32, #tpu.memory_space<vmem>>, vector<8x512xf32>,
    return
  }
  func.func @transform_0(%arg0: i32) -> (i32, i32) {
    %c0_i32 = arith.constant 0 : i32
    %c0_i32_0 = arith.constant 0 : i32
    return %arg0, %c0_i32 : i32, i32
  }
  func.func @transform_1(%arg0: i32) -> (i32, i32) {
    %c0_i32 = arith.constant 0 : i32
    %c0_i32_0 = arith.constant 0 : i32
    return %arg0, %c0_i32 : i32, i32
  }
  func.func @transform_2(%arg0: i32) -> (i32, i32) {
    %c0_i32 = arith.constant 0 : i32
    %c0_i32_0 = arith.constant 0 : i32
    return %arg0, %c0_i32 : i32, i32
  }
  func.func @transform_3(%arg0: i32) -> (i32, i32) {
    %c0_i32 = arith.constant 0 : i32
    %c0_i32_0 = arith.constant 0 : i32
    return %arg0, %c0_i32 : i32, i32
  }
}

</mosaic_0001>

<bundles_post_ra>
// kernel: tpu_custom_call.1
= control target key start
LH: loop header
LB: loop body
LE: loop exit
PB: predicated region body
PF: predicated region fallthrough
CT: control target
= control target key end

     0   :  { %8 = vsyncpa [#allocation3], 0  ;;  %s240_s0 = inlined_call_operand.hbm [shape: f32[8,512], index: 0, kind: input, shape index: {}]   ;;  %s241_s1 = inlined_call_operand.hbm [shape: f32[8,512], index: 1, kind: input, shape index: {}]   ;;  %s242_s2 = inlined_call_operand.hbm [shape: f32[8,512], index: 2, kind: input, shape index: {}]   ;;  %s243_s3 = inlined_call_operand.hbm [shape: f32[8,512], index: 3, kind: output, shape index: {}]  }
   0x1   :  { %9 = vsyncpa [#allocation6], 0  ;;  %s27_s14 = sshll.u32 %s241_s1, 4  ;;  %s28_s14 = int_to_ptr.hbm [resolvable:$true] %s27_s14 }
   0x2   :  { %10 = vsyncpa [#allocation4], 0  ;;  %s204_s15 = smov [#allocation5]   ;;  %s16_s19 = sshll.u32 %s240_s0, 4  ;;  %s17_s19 = int_to_ptr.hbm [resolvable:$true] %s16_s19 }
   0x3   :  { %s29_s16 = sshll.u32 %s204_s15, 4  ;;  %s205_s20 = smov [#allocation2]   ;;  %s30_s16 = int_to_ptr.vmem [resolvable:$true] %s29_s16 }
   0x4   :  { %32 = dma.hbm_to_vmem [thread:$0]  %s28_s14, 512, %s30_s16, [#allocation6]  }
   0x5   :  { %s18_s21 = sshll.u32 %s205_s20, 4  ;;  %s38_s24 = sshll.u32 %s242_s2, 4  ;;  %s19_s21 = int_to_ptr.vmem [resolvable:$true] %s18_s21  ;;  %s39_s24 = int_to_ptr.hbm [resolvable:$true] %s38_s24 }
   0x6   :  { %21 = dma.hbm_to_vmem [thread:$0]  %s17_s19, 512, %s19_s21, [#allocation3]  }
   0x7   :  { %s206_s1 = smov [#allocation7]  }
   0x8   :  { %s40_s25 = sshll.u32 %s206_s1, 4  ;;  %s41_s25 = int_to_ptr.vmem [resolvable:$true] %s40_s25 }
   0x9   :  { %43 = dma.hbm_to_vmem [thread:$0]  %s39_s24, 512, %s41_s25, [#allocation6]  }
   0xa   :  { %198 = dma.done.wait [#allocation3], 512  }
   0xb   :  { %199 = vsyncadd [#allocation3], 4294966784 }
   0xc   :  { %200 = dma.done.wait [#allocation6], 1024  }
   0xd   :  { %201 = vsyncadd [#allocation6], 4294966272  ;;  %v56_v0 = vld [vmem:[#allocation2] sm:$0xff]  ;;  %v57_v4 = vld [vmem:[#allocation2 + $0x8] sm:$0xff]  ;;  %s207_s0 = smov [#allocation8]   ;;  %s87_s28 = sshll.u32 %s243_s3, 4  ;;  %s88_s28 = int_to_ptr.hbm [resolvable:$true] %s87_s28 }
   0xe   :  { %v60_v1 = vld [vmem:[#allocation5] sm:$0xff]  ;;  %v61_v5 = vld [vmem:[#allocation5 + $0x8] sm:$0xff]  ;;  %v58_v8 = vld [vmem:[#allocation2 + $0x10] sm:$0xff]  ;;  %s85_s2 = sshll.u32 %s207_s0, 4  ;;  %s86_s2 = int_to_ptr.vmem [resolvable:$true] %s85_s2 }
   0xf   :  { %v68_v2 = vld [vmem:[#allocation7] sm:$0xff]  ;;  %v64_v3 = vadd.f32 %v60_v1, %v56_v0  ;;  %v69_v6 = vld [vmem:[#allocation7 + $0x8] sm:$0xff]  ;;  %v65_v7 = vadd.f32 %v61_v5, %v57_v4  ;;  %v62_v9 = vld [vmem:[#allocation5 + $0x10] sm:$0xff] }
  0x10   :  { %v70_v10 = vld [vmem:[#allocation7 + $0x10] sm:$0xff]  ;;  %v66_v12 = vadd.f32 %v62_v9, %v58_v8  ;;  %v59_v13 = vld [vmem:[#allocation2 + $0x18] sm:$0xff] }
  0x11   :  { %v72_v11 = vadd.f32 %v68_v2, %v64_v3  ;;  %v63_v14 = vld [vmem:[#allocation5 + $0x18] sm:$0xff]  ;;  %v73_v16 = vadd.f32 %v69_v6, %v65_v7 }
  0x12   :  { %v71_v15 = vld [vmem:[#allocation7 + $0x18] sm:$0xff]  ;;  %v67_v17 = vadd.f32 %v63_v14, %v59_v13  ;;  %v74_v18 = vadd.f32 %v70_v10, %v66_v12 }
  0x13   :  { %76 = vst [vmem:[#allocation8] sm:$0xff] %v72_v11 }
  0x14   :  { %77 = vst [vmem:[#allocation8 + $0x8] sm:$0xff] %v73_v16  ;;  %v75_v19 = vadd.f32 %v71_v15, %v67_v17 }
  0x15   :  { %78 = vst [vmem:[#allocation8 + $0x10] sm:$0xff] %v74_v18 }
  0x16   :  { %79 = vst [vmem:[#allocation8 + $0x18] sm:$0xff] %v75_v19 }
  0x17   :  { %90 = dma.vmem_to_hbm [thread:$0]  %s86_s2, 512, %s88_s28, [#allocation4]  }
  0x18   :  { %202 = dma.done.wait [#allocation4], 512  }
  0x19   :  { %203 = vsyncadd [#allocation4], 4294966784 }
  0x1a   :  { %95 = vsyncpa [#allocation3], 1 }
  0x1b   :  { %96 = vsyncpa [#allocation6], 1 }
  0x1c   :  { %97 = vsyncpa [#allocation4], 1 }

</bundles_post_ra>
